<compile_context>
chip_gen: v7x
topology: tpu7x:2x2x1
jax: 0.10.0
libtpu: 0.0.40
codegen_flags: <defaults>
</compile_context>

<pallas_src>
import functools

import jax
import jax.numpy as jnp
from jax.experimental import pallas as pl
from jax.experimental.pallas import tpu as pltpu


def _round_up(x, m):
    return ((x + m - 1) // m) * m


def _choose_tiles(batch, in_bytes, d_in, h_pad, *, sub_target=512, row_g=16,
                  vmem_data_budget=24 << 20, tb_cap=32768):
    """Pick (tb, sub, n_sub): batch tile, in-kernel sub-block, sub-blocks per tile.

    VMEM math is lane-padding aware: a (tb, d_in) block with d_in < 128 still
    occupies 128 lanes per row; the (1, 1, tb) output block pads to 8 sublanes.
    """
    # Per-row cost: double-buffered x tile + double-buffered output row.
    per_row = 2 * max(d_in, 128) * in_bytes + 2 * 8 * 4
    # Resident weights (double-buffered) + bias / w2 rows (f32).
    fixed = 2 * d_in * h_pad * in_bytes + 4 * h_pad * 4
    avail = max(vmem_data_budget - fixed, per_row * row_g)
    tb = int(avail // per_row)
    tb = max(row_g, min(tb, tb_cap))

    if batch <= sub_target:
        # Single small tile; sub-block == tile.
        tb = max(row_g, min(tb, _round_up(batch, row_g)))
        sub = tb
    else:
        sub = sub_target
        tb = max(sub, (tb // sub) * sub)
        # Keep >= 2 grid steps so the batch axis can shard across both
        # TensorCores on v7x.
        half = _round_up(pl.cdiv(batch, 2), sub)
        tb = min(tb, max(sub, half))
        tb = min(tb, _round_up(batch, sub))
    return tb, sub, tb // sub


def _mlp_kernel(x_ref, w1_ref, b1_ref, w2_ref, b2_ref, o_ref, *, sub, n_sub):
    # x_ref:  [TB, D_in]      (f32 or bf16)
    # w1_ref: [D_in, Hp]      (x dtype), zero-padded to Hp lanes
    # b1_ref: [1, Hp]         f32 (zero-padded)
    # w2_ref: [1, Hp]         f32 (second Linear's weight as a row, zero-padded)
    # b2_ref: [1, 1]          f32, SMEM
    # o_ref:  [1, 1, TB]      lane-dense output row for this tile
    w1 = w1_ref[...]
    b1 = b1_ref[...]
    w2 = w2_ref[...]
    b2 = b2_ref[0, 0]

    def body(s, carry):
        r0 = pl.multiple_of(s * sub, sub)
        xb = x_ref[pl.ds(r0, sub), :]                                  # (sub, D_in)
        # Layer 1: MXU matmul with f32 accumulation; f32 bias + tanh (EUP).
        h = jnp.dot(xb, w1, preferred_element_type=jnp.float32)       # (sub, Hp)
        h = jnp.tanh(h + b1)
        # Layer 2 (out_features == 1): VPU multiply, XLU transpose, sublane
        # reduction -> result is already lane-major for the dense store.
        t = h * w2                                                     # (sub, Hp)
        t_t = jnp.transpose(t)                                         # (Hp, sub)
        y = jnp.sum(t_t, axis=0, keepdims=True) + b2                   # (1, sub)
        o_ref[0, :, pl.ds(r0, sub)] = y.astype(o_ref.dtype)
        return carry

    jax.lax.fori_loop(0, n_sub, body, 0)


def regression_model_forward(x, w1, b1, w2, b2):
    """Forward pass of RegressionModel.

    x:  [B, D_in]   (float32 or bfloat16)
    w1: [D_in, H]   (pre-transposed vs. PyTorch's [out, in])
    b1: [H]
    w2: [H, 1]
    b2: [1]
    returns y: [B, 1] in x.dtype
    """
    B, d_in = x.shape
    H = w1.shape[1]
    in_dtype = x.dtype
    out_dtype = x.dtype
    h_pad = max(_round_up(H, 128), 128)   # lane-pad hidden width (free on VPU/EUP/MXU)

    # Tiny parameter tensors: pad / cast on the wrapper side (negligible bytes).
    w1p = jnp.zeros((d_in, h_pad), in_dtype).at[:, :H].set(w1.astype(in_dtype))
    b1p = jnp.zeros((1, h_pad), jnp.float32).at[:, :H].set(
        b1.reshape(1, H).astype(jnp.float32))
    w2p = jnp.zeros((1, h_pad), jnp.float32).at[:, :H].set(
        w2.reshape(1, H).astype(jnp.float32))
    b2s = b2.reshape(1, 1).astype(jnp.float32)

    in_bytes = jnp.dtype(in_dtype).itemsize
    tb, sub, n_sub = _choose_tiles(B, in_bytes, d_in, h_pad)
    n_tiles = pl.cdiv(B, tb)

    kernel = functools.partial(_mlp_kernel, sub=sub, n_sub=n_sub)

    y = pl.pallas_call(
        kernel,
        out_shape=jax.ShapeDtypeStruct((n_tiles, 1, tb), out_dtype),
        grid=(n_tiles,),
        in_specs=[
            pl.BlockSpec((tb, d_in), lambda i: (i, 0)),       # x: tiled over batch
            pl.BlockSpec((d_in, h_pad), lambda i: (0, 0)),    # w1: resident
            pl.BlockSpec((1, h_pad), lambda i: (0, 0)),       # b1: resident
            pl.BlockSpec((1, h_pad), lambda i: (0, 0)),       # w2 row: resident
            pl.BlockSpec(memory_space=pltpu.MemorySpace.SMEM),  # b2 scalar
        ],
        out_specs=pl.BlockSpec((1, 1, tb), lambda i: (i, 0, 0)),  # lane-dense row
        compiler_params=pltpu.CompilerParams(
            dimension_semantics=("parallel",),         # megacore sharding on v7x
            vmem_limit_bytes=48 * 1024 * 1024,         # safe on v7x (64 MiB phys)
        ),
    )(x, w1p, b1p, w2p, b2s)

    # (n_tiles, 1, tb) -> flat -> drop garbage rows from the partial edge block.
    return y.reshape(-1)[:B].reshape(B, 1)


def init_params(key, input_size, hidden_size, dtype=jnp.float32):
    """Deterministic init mimicking nn.Linear default (uniform +/- 1/sqrt(fan_in))."""
    k1, k2, k3, k4 = jax.random.split(key, 4)
    bound1 = 1.0 / jnp.sqrt(input_size)
    bound2 = 1.0 / jnp.sqrt(hidden_size)
    # Stored already transposed relative to PyTorch's [out, in] convention.
    w1 = jax.random.uniform(k1, (input_size, hidden_size), dtype, -bound1, bound1)
    b1 = jax.random.uniform(k2, (hidden_size,), dtype, -bound1, bound1)
    w2 = jax.random.uniform(k3, (hidden_size, 1), dtype, -bound2, bound2)
    b2 = jax.random.uniform(k4, (1,), dtype, -bound2, bound2)
    return w1, b1, w2, b2


if __name__ == "__main__":
    key = jax.random.PRNGKey(0)
    kx, kp = jax.random.split(key)

    # Small demo shapes. batch=1000 is deliberately not a multiple of the
    # 512-row tile so both the multi-step grid and the partial edge block
    # (no jnp.pad) are exercised.
    batch = 1000
    input_size = 16
    hidden_size = 32

    x = jax.random.normal(kx, (batch, input_size), jnp.float32)
    w1, b1, w2, b2 = init_params(kp, input_size, hidden_size)

    # Pure-JAX reference (high-precision matmuls).
    h_ref = jnp.tanh(
        jnp.dot(x, w1, precision=jax.lax.Precision.HIGHEST) + b1)
    y_ref = jnp.dot(h_ref, w2, precision=jax.lax.Precision.HIGHEST) + b2

    fwd = jax.jit(regression_model_forward)

    # f32 input path.
    y = jax.block_until_ready(fwd(x, w1, b1, w2, b2))
    assert y.shape == (batch, 1)
    assert jnp.allclose(y, y_ref, atol=5e-3, rtol=5e-3), "f32 path mismatch"

    # bf16 input path: x arrives already in bf16 (cast at the producer), which
    # halves the dominant HBM read; accumulation / tanh stay f32 in-kernel.
    x_bf16 = x.astype(jnp.bfloat16)
    y_bf16 = jax.block_until_ready(fwd(x_bf16, w1, b1, w2, b2))
    assert y_bf16.shape == (batch, 1)
    assert jnp.allclose(y_bf16.astype(jnp.float32), y_ref,
                        atol=3e-2, rtol=3e-2), "bf16 path mismatch"

    print("KERNEL_OK")
</pallas_src>

<mosaic_0001>
module attributes {stable_mosaic.version = 11 : i64} {
  func.func @_mlp_kernel(%arg0: i32, %arg1: memref<512x16xf32, #tpu.memory_space<vmem>>, %arg2: memref<16x128xf32, #tpu.memory_space<vmem>>, %arg3: memref<1x128xf32, #tpu.memory_space<vmem>>, %arg4: memref<1x128xf32, #tpu.memory_space<vmem>>, %arg5: memref<1x1xf32, #tpu.memory_space<smem>>, %arg6: memref<1x1x512xf32, #tpu.memory_space<vmem>>) attributes {dimension_semantics = [#tpu.dimension_semantics<parallel>], iteration_bounds = array<i64: 2>, scalar_prefetch = 0 : i64, scratch_operands = 0 : i64, tpu.core_type = #tpu.core_type<tc>, window_params = [{transform_indices = @transform_0, window_bounds = array<i64: 512, 16>}, {pipeline_mode = #tpu.pipeline_mode<synchronous>, transform_indices = @transform_1, window_bounds = array<i64: 16, 128>}, {pipeline_mode = #tpu.pipeline_mode<synchronous>, transform_indices = @transform_2, window_bounds = array<i64: 1, 128>}, {pipeline_mode = #tpu.pipeline_mode<synchronous>, transform_indices = @transform_3, window_bounds = array<i64: 1, 128>}, {transform_indices = @transform_4, window_bounds = array<i64: 1, 1>}, {transform_indices = @transform_5, window_bounds = array<i64: 1, 1, 512>}]} {
    %c0 = arith.constant 0 : index
    %c0_0 = arith.constant 0 : index
    %0 = vector.load %arg2[%c0, %c0_0] : memref<16x128xf32, #tpu.memory_space<vmem>>, vector<16x128xf32>
    %c0_1 = arith.constant 0 : index
    %c0_2 = arith.constant 0 : index
    %1 = vector.load %arg3[%c0_1, %c0_2] : memref<1x128xf32, #tpu.memory_space<vmem>>, vector<1x128xf32>
    %c0_3 = arith.constant 0 : index
    %c0_4 = arith.constant 0 : index
    %2 = vector.load %arg4[%c0_3, %c0_4] : memref<1x128xf32, #tpu.memory_space<vmem>>, vector<1x128xf32>
    %c0_5 = arith.constant 0 : index
    %c0_6 = arith.constant 0 : index
    %3 = memref.load %arg5[%c0_5, %c0_6] : memref<1x1xf32, #tpu.memory_space<smem>>
    %c0_i32 = arith.constant 0 : i32
    %c512_i32 = arith.constant 512 : i32
    %4 = arith.muli %c0_i32, %c512_i32 : i32
    %5 = tpu.assume_multiple %4, 512 : i32
    %6 = arith.index_cast %5 : i32 to index
    %c0_7 = arith.constant 0 : index
    %7 = vector.load %arg1[%6, %c0_7] : memref<512x16xf32, #tpu.memory_space<vmem>>, vector<512x16xf32>
    %cst = arith.constant dense<0.000000e+00> : vector<512x128xf32>
    %8 = tpu.matmul %7, %0, %cst {dimension_numbers = #tpu.dot_dimension_numbers<[1], [0], [0], [1], [0, 0, 1, 1], [], []>} : vector<512x16xf32>, vector<16x128xf32>, vector<512x128xf32> -> vector<512x128xf32>
    %9 = vector.broadcast %1 : vector<1x128xf32> to vector<512x128xf32>
    %10 = arith.addf %8, %9 : vector<512x128xf32>
    %11 = math.tanh %10 : vector<512x128xf32>
    %12 = vector.broadcast %2 : vector<1x128xf32> to vector<512x128xf32>
    %13 = arith.mulf %11, %12 : vector<512x128xf32>
    %14 = tpu.transpose %13, [1, 0] : vector<512x128xf32> -> vector<128x512xf32>
    %cst_8 = arith.constant dense<0.000000e+00> : vector<512xf32>
    %15 = vector.multi_reduction <add>, %14, %cst_8 [0] : vector<128x512xf32> to vector<512xf32>
    %16 = vector.shape_cast %15 : vector<512xf32> to vector<1x512xf32>
    %17 = vector.broadcast %3 : f32 to vector<1x512xf32>
    %18 = arith.addf %16, %17 : vector<1x512xf32>
    %c0_9 = arith.constant 0 : index
    %c0_10 = arith.constant 0 : index
    %19 = arith.index_cast %5 : i32 to index
    %20 = vector.load %arg6[%c0_9, %c0_10, %19] : memref<1x1x512xf32, #tpu.memory_space<vmem>>, vector<1x1x512xf32>
    %21 = vector.shape_cast %20 : vector<1x1x512xf32> to vector<1x512xf32>
    %22 = vector.shape_cast %18 : vector<1x512xf32> to vector<1x1x512xf32>
    tpu.vector_store %arg6[%c0_9, %c0_10, %19], %22 {strides = array<i32>} : memref<1x1x512xf32, #tpu.memory_space<vmem>>, vector<1x1x512xf32>,
    %c1_i32 = arith.constant 1 : i32
    return
  }
  func.func @transform_0(%arg0: i32) -> (i32, i32) {
    %c0_i32 = arith.constant 0 : i32
    %c0_i32_0 = arith.constant 0 : i32
    return %arg0, %c0_i32 : i32, i32
  }
  func.func @transform_1(%arg0: i32) -> (i32, i32) {
    %c0_i32 = arith.constant 0 : i32
    %c0_i32_0 = arith.constant 0 : i32
    %c0_i32_1 = arith.constant 0 : i32
    return %c0_i32, %c0_i32_0 : i32, i32
  }
  func.func @transform_2(%arg0: i32) -> (i32, i32) {
    %c0_i32 = arith.constant 0 : i32
    %c0_i32_0 = arith.constant 0 : i32
    %c0_i32_1 = arith.constant 0 : i32
    return %c0_i32, %c0_i32_0 : i32, i32
  }
  func.func @transform_3(%arg0: i32) -> (i32, i32) {
    %c0_i32 = arith.constant 0 : i32
    %c0_i32_0 = arith.constant 0 : i32
    %c0_i32_1 = arith.constant 0 : i32
    return %c0_i32, %c0_i32_0 : i32, i32
  }
  func.func @transform_4(%arg0: i32) -> (i32, i32) {
    %c0_i32 = arith.constant 0 : i32
    %c0_i32_0 = arith.constant 0 : i32
    %c0_i32_1 = arith.constant 0 : i32
    return %c0_i32, %c0_i32_0 : i32, i32
  }
  func.func @transform_5(%arg0: i32) -> (i32, i32, i32) {
    %c0_i32 = arith.constant 0 : i32
    %c0_i32_0 = arith.constant 0 : i32
    %c0_i32_1 = arith.constant 0 : i32
    return %arg0, %c0_i32, %c0_i32_0 : i32, i32, i32
  }
}

</mosaic_0001>

<bundles_post_ra>
// kernel: regression_model_forward.1
= control target key start
LH: loop header
LB: loop body
LE: loop exit
PB: predicated region body
PF: predicated region fallthrough
CT: control target
= control target key end

     0   :  { %s2381_s0 = inlined_call_operand.vmem [shape: f32[1000,16], index: 0, kind: input, shape index: {}]   ;;  %s2382_s1 = inlined_call_operand.vmem [shape: f32[16,128], index: 1, kind: input, shape index: {}]   ;;  %s2383_s2 = inlined_call_operand.vmem [shape: f32[1,128], index: 2, kind: input, shape index: {}]   ;;  %s2384_s3 = inlined_call_operand.vmem [shape: f32[1,128], index: 3, kind: input, shape index: {}]   ;;  %s2385_s4 = inlined_call_operand.<no memory space> [shape: f32[1,1], index: 4, kind: input, shape index: {}]   ;;  %s2386_s5 = inlined_call_operand.hbm [shape: f32[2,1,512], index: 5, kind: output, shape index: {}]  }
   0x1   :  { %10 = sst [smem:[#allocation2]] %s2385_s4 }
   0x2   :  { %11 = vsyncpa [#allocation4], 0 }
   0x3   :  { %13 = vsyncpa [#allocation4 + $0x1], 0  ;;  %s1876_s20 = smov 0   ;;  %s1878_s21 = smov 0  }
   0x4   :  { %s1880_s22 = smov 0   ;;  %s1882_s23 = smov 0  }
   0x5 LB: > { %s1357_s4 = sadd.s32 4294967295, %s1839_s23   ;;  %s1358_s24 = sadd.s32 4294967294, %s1839_s23   ;;  %s1839_s23 = sphi %s1882_s23, %s2392_s23   ;;  %s1835_s22 = sphi %s1880_s22, %s2391_s22   ;;  %s1831_s21 = sphi %s1878_s21, %s2390_s21   ;;  %s1827_s20 = sphi %s1876_s20, %s2389_s20  }
   0x6   : > { %s1899_s25 = sadd.s32 1, %s1839_s23   ;;  %s136_s26 = sadd.s32 1, %s1835_s22 }
   0x7   : > { %s133_s27 = ssub.s32 %s1839_s23, %s1899_s25  ;;  %p146_p0 = scmp.ne.s32.totalorder %s1835_s22, %s1831_s21 }
   0x8   : > { %p134_p1 = scmp.eq.s32.totalorder %s133_s27, 0  ;;  %p147_p2 = scmp.eq.s32.totalorder %s1357_s4, 1 }
   0x9   : > { %p152_p3 = scmp.ne.s32.totalorder %s1831_s21, %s1827_s20  ;;  %p153_p4 = scmp.eq.s32.totalorder %s1358_s24, 1 }
   0xa   : > { %s1909_s28 = scalar_select %p134_p1, %s1835_s22, %s136_s26  }
   0xb   : > { %p1911_p5 = por %p147_p2, %p146_p0  ;;  %p1915_p6 = por %p153_p4, %p152_p3 }
   0xc   : > { %p1361_p7 = scmp.ge.s32.totalorder %s1839_s23, 1  ;;  %p200_p8 = scmp.lt.s32.totalorder %s1839_s23, 3 }
   0xe   : > { %p201_p9 = pnand %p1361_p7, %p200_p8 }
   0xf   : > { %v246_v0 = vld [vmem:[%s2382_s1] sm:$0xff] (!%p201_p9)  ;;  %v247_v1 = vld [vmem:[%s2382_s1 + $0x8] sm:$0xff] (!%p201_p9)  ;;  %s1927_s10 = sshll.u32 (!%p201_p9), %s1357_s4, 6  ;;  %vm321_vm0 = vcmask (!%p201_p9), 130048   ;;  %s250_s4 = sld [smem:[#allocation2]] (!%p201_p9) }
  0x10   : > { %204 = sbr.rel (%p201_p9) target bundleno = 580 (0x244), region = 40  ;;  %v1603_v2 = vpack.c.bf16 (!%p201_p9), %v247_v1, %v246_v0  ;;  %p237_p10 = scmp.lt.s32.totalorder (!%p201_p9), %s1927_s10, 124 }
  0x11   : > { %s229_s24 = sand.u32 (!%p201_p9), 1, %s1831_s21   ;;  %s2339_s9 = scalar_lea.hbm (!%p201_p9), %s2386_s5, %s1927_s10 }
  0x12   : > { %1604 = vmatprep.subr.bf16.mxu0 (!%p201_p9), %v1603_v2  ;;  %1607 = vmatprep.subr.bf16.mxu1 (!%p201_p9), %v1603_v2  ;;  %s1362_s26 = sshll.u32 (!%p201_p9), %s229_s24, 2  ;;  %s1842_s13 = smov (!%p201_p9), [#allocation3]  }
  0x13   : > { %1606 = vmatpush3.bf16.msra.mxu0 (!%p201_p9), %v1603_v2  ;;  %1608 = vmatpush3.bf16.msra.mxu1 (!%p201_p9), %v1603_v2  ;;  %s231_s27 = scalar_lea.vmem (!%p201_p9), [#allocation3], %s1362_s26  ;;  %s1781_s14 = sshll.u32 (!%p201_p9), %s1842_s13, 4  ;;  %s1782_s14 = int_to_ptr.vmem [resolvable:$false] %s1781_s14 }
  0x14   : > { %s1299_s6 = sshll.u32 (!%p201_p9), %s231_s27, 4  ;;  %s2341_s6 = int_to_ptr.vmem [resolvable:$true] %s1299_s6 }
  0x15   : > { %p1784_p0 = scmp.lt.s32.totalorder (!%p201_p9), %s2341_s6, %s1782_s14 }
  0x17   : > { %s238_s11 = scalar_select %p237_p10, %s1927_s10, 124 }
  0x19   : > { %s1364_s12 = sshll.u32 %s238_s11, 3  ;;  %s1285_s11 = scalar_lea.sflag [#allocation4], %s229_s24 }
  0x1a   : > { %s1934_s15 = scalar_lea.vmem %s2381_s0, %s1364_s12  ;;  %s1777_s12 = scalar_lea.vmem %s2341_s6, 64 }
  0x1b   : > { %v251_v3 = vld [vmem:[%s1934_s15] sm:$0xff]  ;;  %v252_v4 = vld [vmem:[%s1934_s15 + $0x8] sm:$0xff]  ;;  %v253_v5 = vld [vmem:[%s1934_s15 + $0x10] sm:$0xff]  ;;  %p1778_p11 = scmp.ne.s32.totalorder %s2341_s6, %s1777_s12 }
  0x1c   : > { %1507 = vmatprep.mubr.msk.f32.mxu0 %vm321_vm0, %v251_v3  ;;  %v254_v6 = vld [vmem:[%s1934_s15 + $0x18] sm:$0xff]  ;;  %v255_v7 = vld [vmem:[%s1934_s15 + $0x20] sm:$0xff]  ;;  %v256_v8 = vld [vmem:[%s1934_s15 + $0x28] sm:$0xff] }
  0x1d   : > { %1508 = vmatmul.mubr.msk.f32.vlgmr.msra.gmra.mrb[0].mxu0 %vm321_vm0, %v252_v4  ;;  %v257_v9 = vld [vmem:[%s1934_s15 + $0x30] sm:$0xff]  ;;  %v283_v10 = vld [vmem:[%s1934_s15 + $0x100] sm:$0xff]  ;;  %v284_v11 = vld [vmem:[%s1934_s15 + $0x108] sm:$0xff]  ;;  %p1779_p12 = pnand %p1778_p11, %p1911_p5 }
  0x1e   : > { %1510 = vmatprep.mubr.msk.f32.mxu0 %vm321_vm0, %v253_v5  ;;  %1555 = vmatprep.mubr.msk.f32.mxu1 %vm321_vm0, %v283_v10  ;;  %v285_v12 = vld [vmem:[%s1934_s15 + $0x110] sm:$0xff]  ;;  %v258_v13 = vld [vmem:[%s1934_s15 + $0x38] sm:$0xff]  ;;  %v259_v15 = vld [vmem:[%s1934_s15 + $0x40] sm:$0xff] }
  0x1f   : > { %1556 = vmatmul.mubr.msk.f32.vlgmr.msra.gmra.mrb[0].mxu1 %vm321_vm0, %v284_v11  ;;  %v286_v14 = vld [vmem:[%s1934_s15 + $0x118] sm:$0xff]  ;;  %v287_v16 = vld [vmem:[%s1934_s15 + $0x120] sm:$0xff]  ;;  %v260_v17 = vld [vmem:[%s1934_s15 + $0x48] sm:$0xff]  ;;  %p1780_p13 = pneg %p1779_p12 }
  0x20   : > { %1558 = vmatprep.mubr.msk.f32.mxu1 %vm321_vm0, %v285_v12  ;;  %v288_v18 = vld [vmem:[%s1934_s15 + $0x128] sm:$0xff]  ;;  %v261_v19 = vld [vmem:[%s1934_s15 + $0x50] sm:$0xff]  ;;  %v262_v21 = vld [vmem:[%s1934_s15 + $0x58] sm:$0xff] }
  0x21   : > { %1511 = vmatmul.mubr.msk.f32.gmra.mrb[2].mxu0 %vm321_vm0, %v254_v6  ;;  %v289_v20 = vld [vmem:[%s1934_s15 + $0x130] sm:$0xff]  ;;  %v290_v22 = vld [vmem:[%s1934_s15 + $0x138] sm:$0xff]  ;;  %v263_v23 = vld [vmem:[%s1934_s15 + $0x60] sm:$0xff] }
  0x22   : > { %1513 = vmatprep.mubr.msk.f32.mxu0 %vm321_vm0, %v255_v7  ;;  %v291_v24 = vld [vmem:[%s1934_s15 + $0x140] sm:$0xff]  ;;  %v264_v25 = vld [vmem:[%s1934_s15 + $0x68] sm:$0xff]  ;;  %v265_v27 = vld [vmem:[%s1934_s15 + $0x70] sm:$0xff] }
  0x23   : > { %1559 = vmatmul.mubr.msk.f32.gmra.mrb[2].mxu1 %vm321_vm0, %v286_v14  ;;  %v292_v26 = vld [vmem:[%s1934_s15 + $0x148] sm:$0xff]  ;;  %v293_v28 = vld [vmem:[%s1934_s15 + $0x150] sm:$0xff]  ;;  %v266_v29 = vld [vmem:[%s1934_s15 + $0x78] sm:$0xff] }
  0x24   : > { %1561 = vmatprep.mubr.msk.f32.mxu1 %vm321_vm0, %v287_v16  ;;  %v294_v30 = vld [vmem:[%s1934_s15 + $0x158] sm:$0xff]  ;;  %v267_v31 = vld [vmem:[%s1934_s15 + $0x80] sm:$0xff]  ;;  %v268_v33 = vld [vmem:[%s1934_s15 + $0x88] sm:$0xff] }
  0x25   : > { %1514 = vmatmul.mubr.msk.f32.gmra.mrb[4].mxu0 %vm321_vm0, %v256_v8  ;;  %v295_v32 = vld [vmem:[%s1934_s15 + $0x160] sm:$0xff]  ;;  %v296_v34 = vld [vmem:[%s1934_s15 + $0x168] sm:$0xff]  ;;  %v269_v35 = vld [vmem:[%s1934_s15 + $0x90] sm:$0xff] }
  0x26   : > { %1516 = vmatprep.mubr.msk.f32.mxu0 %vm321_vm0, %v257_v9  ;;  %v297_v36 = vld [vmem:[%s1934_s15 + $0x170] sm:$0xff]  ;;  %v270_v37 = vld [vmem:[%s1934_s15 + $0x98] sm:$0xff]  ;;  %v271_v39 = vld [vmem:[%s1934_s15 + $0xa0] sm:$0xff] }
  0x27   : > { %1562 = vmatmul.mubr.msk.f32.gmra.mrb[4].mxu1 %vm321_vm0, %v288_v18  ;;  %v298_v38 = vld [vmem:[%s1934_s15 + $0x178] sm:$0xff]  ;;  %v299_v40 = vld [vmem:[%s1934_s15 + $0x180] sm:$0xff]  ;;  %v272_v41 = vld [vmem:[%s1934_s15 + $0xa8] sm:$0xff] }
  0x28   : > { %1564 = vmatprep.mubr.msk.f32.mxu1 %vm321_vm0, %v289_v20  ;;  %v300_v42 = vld [vmem:[%s1934_s15 + $0x188] sm:$0xff]  ;;  %v273_v43 = vld [vmem:[%s1934_s15 + $0xb0] sm:$0xff]  ;;  %v274_v45 = vld [vmem:[%s1934_s15 + $0xb8] sm:$0xff] }
  0x29   : > { %1517 = vmatmul.mubr.msk.f32.gmra.mrb[6].mxu0 %vm321_vm0, %v258_v13  ;;  %v301_v44 = vld [vmem:[%s1934_s15 + $0x190] sm:$0xff]  ;;  %v302_v46 = vld [vmem:[%s1934_s15 + $0x198] sm:$0xff]  ;;  %v275_v47 = vld [vmem:[%s1934_s15 + $0xc0] sm:$0xff] }
  0x2a   : > { %1519 = vmatprep.mubr.msk.f32.mxu0 %vm321_vm0, %v259_v15  ;;  %v303_v48 = vld [vmem:[%s1934_s15 + $0x1a0] sm:$0xff]  ;;  %v276_v49 = vld [vmem:[%s1934_s15 + $0xc8] sm:$0xff]  ;;  %v277_v51 = vld [vmem:[%s1934_s15 + $0xd0] sm:$0xff] }
  0x2b   : > { %1565 = vmatmul.mubr.msk.f32.gmra.mrb[6].mxu1 %vm321_vm0, %v290_v22  ;;  %v304_v50 = vld [vmem:[%s1934_s15 + $0x1a8] sm:$0xff]  ;;  %v305_v52 = vld [vmem:[%s1934_s15 + $0x1b0] sm:$0xff]  ;;  %v278_v53 = vld [vmem:[%s1934_s15 + $0xd8] sm:$0xff] }
  0x2c   : > { %1567 = vmatprep.mubr.msk.f32.mxu1 %vm321_vm0, %v291_v24  ;;  %v306_v54 = vld [vmem:[%s1934_s15 + $0x1b8] sm:$0xff]  ;;  %v279_v55 = vld [vmem:[%s1934_s15 + $0xe0] sm:$0xff]  ;;  %v280_v57 = vld [vmem:[%s1934_s15 + $0xe8] sm:$0xff] }
  0x2d   : > { %1520 = vmatmul.mubr.msk.f32.gmra.mrb[8].mxu0 %vm321_vm0, %v260_v17  ;;  %v307_v56 = vld [vmem:[%s1934_s15 + $0x1c0] sm:$0xff]  ;;  %v308_v58 = vld [vmem:[%s1934_s15 + $0x1c8] sm:$0xff]  ;;  %v281_v59 = vld [vmem:[%s1934_s15 + $0xf0] sm:$0xff] }
  0x2e   : > { %1522 = vmatprep.mubr.msk.f32.mxu0 %vm321_vm0, %v261_v19  ;;  %v309_v60 = vld [vmem:[%s1934_s15 + $0x1d0] sm:$0xff]  ;;  %v282_v61 = vld [vmem:[%s1934_s15 + $0xf8] sm:$0xff]  ;;  %v311_v63 = vld [vmem:[%s1934_s15 + $0x1e0] sm:$0xff] }
  0x2f   : > { %1568 = vmatmul.mubr.msk.f32.gmra.mrb[8].mxu1 %vm321_vm0, %v292_v26  ;;  %v310_v62 = vld [vmem:[%s1934_s15 + $0x1d8] sm:$0xff]  ;;  %v312_v0 = vld [vmem:[%s1934_s15 + $0x1e8] sm:$0xff]  ;;  %v313_v1 = vld [vmem:[%s1934_s15 + $0x1f0] sm:$0xff] }
  0x30   : > { %1570 = vmatprep.mubr.msk.f32.mxu1 %vm321_vm0, %v293_v28  ;;  %v314_v2 = vld [vmem:[%s1934_s15 + $0x1f8] sm:$0xff]  ;;  %v2067_v3 = vld [vmem:[%s2383_s2] ss:$0 sm:$0xff]  ;;  %s1783_s15 = scalar_lea.vmem %s1782_s14, 128 }
  0x31   : > { %1523 = vmatmul.mubr.msk.f32.gmra.mrb[10].mxu0 %vm321_vm0, %v262_v21  ;;  %v2080_v17 = vld [vmem:[%s2384_s3] ss:$0 sm:$0xff]  ;;  %p1785_p1 = scmp.lt.s32.totalorder %s1783_s15, %s1777_s12 }
  0x32   : > { %1525 = vmatprep.mubr.msk.f32.mxu0 %vm321_vm0, %v263_v23 }
  0x33   : > { %1571 = vmatmul.mubr.msk.f32.gmra.mrb[10].mxu1 %vm321_vm0, %v294_v30  ;;  %p1786_p2 = por %p1785_p1, %p1784_p0 }
  0x34   : > { %1573 = vmatprep.mubr.msk.f32.mxu1 %vm321_vm0, %v295_v32 }
  0x35   : > { %1526 = vmatmul.mubr.msk.f32.gmra.mrb[12].mxu0 %vm321_vm0, %v264_v25  ;;  %p1787_p3 = pnand %p1786_p2, %p1780_p13 }
  0x36   : > { %1528 = vmatprep.mubr.msk.f32.mxu0 %vm321_vm0, %v265_v27 }
  0x37   : > { %1574 = vmatmul.mubr.msk.f32.gmra.mrb[12].mxu1 %vm321_vm0, %v296_v34 }
  0x38   : > { %1576 = vmatprep.mubr.msk.f32.mxu1 %vm321_vm0, %v297_v36 }
  0x39   : > { %1529 = vmatmul.mubr.msk.f32.gmra.mrb[14].mxu0 %vm321_vm0, %v266_v29 }
  0x3a   : > { %1531 = vmatprep.mubr.msk.f32.mxu0 %vm321_vm0, %v267_v31 }
  0x3b   : > { %1577 = vmatmul.mubr.msk.f32.gmra.mrb[14].mxu1 %vm321_vm0, %v298_v38 }
  0x3c   : > { %1579 = vmatprep.mubr.msk.f32.mxu1 %vm321_vm0, %v299_v40 }
  0x3d   : > { %1532 = vmatmul.mubr.msk.f32.gmra.mrb[16].mxu0 %vm321_vm0, %v268_v33 }
  0x3e   : > { %1534 = vmatprep.mubr.msk.f32.mxu0 %vm321_vm0, %v269_v35 }
  0x3f   : > { %1580 = vmatmul.mubr.msk.f32.gmra.mrb[16].mxu1 %vm321_vm0, %v300_v42 }
  0x40   : > { %1582 = vmatprep.mubr.msk.f32.mxu1 %vm321_vm0, %v301_v44 }
  0x41   : > { %1535 = vmatmul.mubr.msk.f32.gmra.mrb[18].mxu0 %vm321_vm0, %v270_v37 }
  0x42   : > { %1537 = vmatprep.mubr.msk.f32.mxu0 %vm321_vm0, %v271_v39 }
  0x43   : > { %1583 = vmatmul.mubr.msk.f32.gmra.mrb[18].mxu1 %vm321_vm0, %v302_v46 }
  0x44   : > { %1585 = vmatprep.mubr.msk.f32.mxu1 %vm321_vm0, %v303_v48 }
  0x45   : > { %1538 = vmatmul.mubr.msk.f32.gmra.mrb[20].mxu0 %vm321_vm0, %v272_v41 }
  0x46   : > { %1540 = vmatprep.mubr.msk.f32.mxu0 %vm321_vm0, %v273_v43 }
  0x47   : > { %1586 = vmatmul.mubr.msk.f32.gmra.mrb[20].mxu1 %vm321_vm0, %v304_v50 }
  0x48   : > { %1588 = vmatprep.mubr.msk.f32.mxu1 %vm321_vm0, %v305_v52 }
  0x49   : > { %1541 = vmatmul.mubr.msk.f32.gmra.mrb[22].mxu0 %vm321_vm0, %v274_v45 }
  0x4a   : > { %1543 = vmatprep.mubr.msk.f32.mxu0 %vm321_vm0, %v275_v47 }
  0x4b   : > { %1589 = vmatmul.mubr.msk.f32.gmra.mrb[22].mxu1 %vm321_vm0, %v306_v54 }
  0x4c   : > { %1591 = vmatprep.mubr.msk.f32.mxu1 %vm321_vm0, %v307_v56 }
  0x4d   : > { %1544 = vmatmul.mubr.msk.f32.gmra.mrb[24].mxu0 %vm321_vm0, %v276_v49 }
  0x4e   : > { %1546 = vmatprep.mubr.msk.f32.mxu0 %vm321_vm0, %v277_v51 }
  0x4f   : > { %1592 = vmatmul.mubr.msk.f32.gmra.mrb[24].mxu1 %vm321_vm0, %v308_v58 }
  0x50   : > { %1594 = vmatprep.mubr.msk.f32.mxu1 %vm321_vm0, %v309_v60 }
  0x51   : > { %1547 = vmatmul.mubr.msk.f32.gmra.mrb[26].mxu0 %vm321_vm0, %v278_v53 }
  0x52   : > { %1549 = vmatprep.mubr.msk.f32.mxu0 %vm321_vm0, %v279_v55 }
  0x53   : > { %1595 = vmatmul.mubr.msk.f32.gmra.mrb[26].mxu1 %vm321_vm0, %v310_v62 }
  0x54   : > { %1597 = vmatprep.mubr.msk.f32.mxu1 %vm321_vm0, %v311_v63 }
  0x55   : > { %1550 = vmatmul.mubr.msk.f32.gmra.mrb[28].mxu0 %vm321_vm0, %v280_v57 }
  0x56   : > { %1552 = vmatprep.mubr.msk.f32.mxu0 %vm321_vm0, %v281_v59 }
  0x57   : > { %1598 = vmatmul.mubr.msk.f32.gmra.mrb[28].mxu1 %vm321_vm0, %v312_v0 }
  0x58   : > { %1600 = vmatprep.mubr.msk.f32.mxu1 %vm321_vm0, %v313_v1 }
  0x59   : > { %1553 = vmatmul.mubr.msk.f32.gmra.mrb[30].mxu0 %vm321_vm0, %v282_v61 }
  0x5b   : > { %1601 = vmatmul.mubr.msk.f32.gmra.mrb[30].mxu1 %vm321_vm0, %v314_v2 }
  0xf0   : > { %v1509_v4 = vpop.f32.mrb[0].mxu0 }
  0xf1   : > { %v580_v5 = vpop.f32.mrb[1].mxu0  ;;  %v586_v6 = vadd.f32 %v1509_v4, %v2067_v3 }
  0xf2   : > { %v581_v7 = vadd.f32 %v2067_v3, %v580_v5  ;;  %v2072_v12 = vpop.f32.mrb[0].mxu1 }
  0xf3   : > { %v2074_v14 = vpop.f32.mrb[1].mxu1 }
  0xf4   : > { %1649 = vtanh.f32 %v581_v7  ;;  %v1512_v8 = vpop.f32.mrb[2].mxu0 }
  0xf5   : > { %v590_v9 = vpop.f32.mrb[3].mxu0  ;;  %1651 = vtanh.f32 %v586_v6  ;;  %v596_v15 = vadd.f32 %v1512_v8, %v2067_v3 }
  0xf6   : > { %v591_v10 = vadd.f32 %v2067_v3, %v590_v9  ;;  %v2082_v18 = vpop.f32.mrb[2].mxu1 }
  0xf7   : > { %v2084_v20 = vpop.f32.mrb[3].mxu1 }
  0xf8   : > { %v1515_v11 = vpop.f32.mrb[4].mxu0  ;;  %1653 = vtanh.f32 %v591_v10 }
  0xf9   : > { %v600_v13 = vpop.f32.mrb[5].mxu0  ;;  %1655 = vtanh.f32 %v596_v15  ;;  %v606_v29 = vadd.f32 %v1515_v11, %v2067_v3 }
  0xfa   : > { %v601_v22 = vadd.f32 %v2067_v3, %v600_v13  ;;  %v2088_v26 = vpop.f32.mrb[4].mxu1 }
  0xfb   : > { %v2090_v28 = vpop.f32.mrb[5].mxu1 }
  0xfc   : > { %v1518_v16 = vpop.f32.mrb[6].mxu0  ;;  %1657 = vtanh.f32 %v601_v22 }
  0xfd   : > { %v610_v19 = vpop.f32.mrb[7].mxu0  ;;  %1659 = vtanh.f32 %v606_v29  ;;  %v616_v43 = vadd.f32 %v1518_v16, %v2067_v3 }
  0xfe   : > { %v1650_v21 = vpop.eup %1649  ;;  %v2094_v33 = vpop.f32.mrb[6].mxu1  ;;  %v611_v36 = vadd.f32 %v2067_v3, %v610_v19 }
  0xff   : > { %v969_v23 = vmul.f32 %v1650_v21, %v2080_v17  ;;  %v1652_v24 = vpop.eup %1651  ;;  %v2096_v35 = vpop.f32.mrb[7].mxu1 }
 0x100   : > { %v1521_v25 = vpop.f32.mrb[8].mxu0  ;;  %v970_v30 = vmul.f32 %v1652_v24, %v2080_v17  ;;  %1661 = vtanh.f32 %v611_v36 }
 0x101   : > { %v620_v27 = vpop.f32.mrb[9].mxu0  ;;  %1033 = vxpose.xlu0.b32.start [1/16] %v969_v23, 128  ;;  %1663 = vtanh.f32 %v616_v43  ;;  %v626_v55 = vadd.f32 %v1521_v25, %v2067_v3 }
 0x102   : > { %v1654_v31 = vpop.eup %1653  ;;  %v2102_v40 = vpop.f32.mrb[8].mxu1  ;;  %v621_v50 = vadd.f32 %v2067_v3, %v620_v27 }
 0x103   : > { %v971_v37 = vmul.f32 %v1654_v31, %v2080_v17  ;;  %v1656_v38 = vpop.eup %1655  ;;  %v2104_v42 = vpop.f32.mrb[9].mxu1 }
 0x104   : > { %v1524_v32 = vpop.f32.mrb[10].mxu0  ;;  %v972_v44 = vmul.f32 %v1656_v38, %v2080_v17  ;;  %1665 = vtanh.f32 %v621_v50 }
 0x105   : > { %v630_v34 = vpop.f32.mrb[11].mxu0  ;;  %1034 = vxpose.xlu0.b32.cont [2/16] %v970_v30, 128  ;;  %v636_v9 = vadd.f32 %v1524_v32, %v2067_v3 }
 0x106   : > { %v1658_v45 = vpop.eup %1657  ;;  %v2110_v47 = vpop.f32.mrb[10].mxu1  ;;  %v631_v2 = vadd.f32 %v2067_v3, %v630_v34 }
 0x107   : > { %v2114_v49 = vpop.f32.mrb[11].mxu1  ;;  %v973_v51 = vmul.f32 %v1658_v45, %v2080_v17  ;;  %v1660_v52 = vpop.eup %1659 }
 0x108   : > { %v2100_v39 = vpop.f32.mrb[12].mxu0  ;;  %v974_v60 = vmul.f32 %v1660_v52, %v2080_v17 }
 0x109   : > { %v640_v41 = vpop.f32.mrb[13].mxu0  ;;  %1035 = vxpose.xlu0.b32.cont [3/16] %v971_v37, 128  ;;  %v646_v37 = vadd.f32 %v2100_v39, %v2067_v3 }
 0x10a   : > { %v2118_v54 = vpop.f32.mrb[12].mxu1  ;;  %v1662_v61 = vpop.eup %1661  ;;  %v641_v27 = vadd.f32 %v2067_v3, %v640_v41 }
 0x10b   : > { %v2121_v57 = vpop.f32.mrb[13].mxu1  ;;  %v975_v5 = vmul.f32 %v1662_v61, %v2080_v17  ;;  %v1664_v6 = vpop.eup %1663 }
 0x10c   : > { %v2108_v46 = vpop.f32.mrb[14].mxu0  ;;  %v976_v15 = vmul.f32 %v1664_v6, %v2080_v17 }
 0x10d   : > { %v2112_v48 = vpop.f32.mrb[15].mxu0  ;;  %1036 = vxpose.xlu0.b32.cont [4/16] %v972_v44, 128 }
 0x10e   : > { %v2126_v63 = vpop.f32.mrb[14].mxu1  ;;  %v1666_v16 = vpop.eup %1665 }
 0x10f   : > { %v2128_v1 = vpop.f32.mrb[15].mxu1  ;;  %v977_v31 = vmul.f32 %v1666_v16, %v2080_v17 }
 0x110   : > { %v1533_v53 = vpop.f32.mrb[16].mxu0 }
 0x111   : > { %v660_v56 = vpop.f32.mrb[17].mxu0  ;;  %1037 = vxpose.xlu0.b32.cont [5/16] %v973_v51, 128  ;;  %v666_v58 = vadd.f32 %v1533_v53, %v2067_v3 }
 0x112   : > { %v661_v59 = vadd.f32 %v2067_v3, %v660_v56  ;;  %v2133_v8 = vpop.f32.mrb[16].mxu1 }
 0x113   : > { %v2136_v11 = vpop.f32.mrb[17].mxu1 }
 0x114   : > { %1667 = vtanh.f32 %v661_v59  ;;  %v1536_v62 = vpop.f32.mrb[18].mxu0  ;;  %v651_v59 = vadd.f32 %v2067_v3, %v2112_v48 }
 0x115   : > { %1669 = vtanh.f32 %v626_v55  ;;  %1038 = vxpose.xlu0.b32.cont [6/16] %v974_v60, 128  ;;  %v670_v0 = vpop.f32.mrb[19].mxu0  ;;  %v676_v13 = vadd.f32 %v1536_v62, %v2067_v3 }
 0x116   : > { %1671 = vtanh.f32 %v666_v58  ;;  %v671_v4 = vadd.f32 %v2067_v3, %v670_v0  ;;  %v2141_v22 = vpop.f32.mrb[18].mxu1 }
 0x117   : > { %v2143_v24 = vpop.f32.mrb[19].mxu1 }
 0x118   : > { %1673 = vtanh.f32 %v671_v4  ;;  %v1539_v7 = vpop.f32.mrb[20].mxu0  ;;  %v656_v4 = vadd.f32 %v2108_v46, %v2067_v3 }
 0x119   : > { %1039 = vxpose.xlu0.b32.cont [7/16] %v975_v5, 128  ;;  %v680_v10 = vpop.f32.mrb[21].mxu0  ;;  %1675 = vtanh.f32 %v631_v2  ;;  %v686_v44 = vadd.f32 %v1539_v7, %v2067_v3 }
 0x11a   : > { %v681_v19 = vadd.f32 %v2067_v3, %v680_v10  ;;  %1677 = vtanh.f32 %v636_v9  ;;  %v2150_v36 = vpop.f32.mrb[20].mxu1 }
 0x11b   : > { %1679 = vtanh.f32 %v676_v13  ;;  %v2154_v43 = vpop.f32.mrb[21].mxu1  ;;  %v741_v13 = vadd.f32 %v2067_v3, %v2074_v14 }
 0x11c   : > { %v1542_v21 = vpop.f32.mrb[22].mxu0  ;;  %1681 = vtanh.f32 %v681_v19 }
 0x11d   : > { %1040 = vxpose.xlu0.b32.cont [8/16] %v976_v15, 128  ;;  %v690_v23 = vpop.f32.mrb[23].mxu0  ;;  %1683 = vtanh.f32 %v641_v27  ;;  %v696_v48 = vadd.f32 %v1542_v21, %v2067_v3 }
 0x11e   : > { %v1668_v25 = vpop.eup %1667  ;;  %v691_v52 = vadd.f32 %v2067_v3, %v690_v23  ;;  %v2162_v55 = vpop.f32.mrb[22].mxu1  ;;  %1685 = vtanh.f32 %v646_v37 }
 0x11f   : > { %v1670_v29 = vpop.eup %1669  ;;  %v985_v30 = vmul.f32 %v1668_v25, %v2080_v17  ;;  %v2165_v58 = vpop.f32.mrb[23].mxu1  ;;  %1687 = vtanh.f32 %v686_v44 }
 0x120   : > { %v1672_v32 = vpop.eup %1671  ;;  %v2148_v34 = vpop.f32.mrb[24].mxu0  ;;  %v978_v50 = vmul.f32 %v1670_v29, %v2080_v17  ;;  %1689 = vtanh.f32 %v691_v52 }
 0x121   : > { %1065 = vxpose.xlu1.b32.start [1/16] %v985_v30, 128  ;;  %1041 = vxpose.xlu0.b32.cont [9/16] %v977_v31, 128  ;;  %v700_v38 = vpop.f32.mrb[25].mxu0  ;;  %v986_v45 = vmul.f32 %v1672_v32, %v2080_v17  ;;  %1691 = vtanh.f32 %v651_v59  ;;  %v746_v31 = vadd.f32 %v2072_v12, %v2067_v3 }
 0x122   : > { %v1674_v41 = vpop.eup %1673  ;;  %v2172_v2 = vpop.f32.mrb[24].mxu1  ;;  %v701_v16 = vadd.f32 %v2067_v3, %v700_v38  ;;  %1693 = vtanh.f32 %v656_v4  ;;  %v706_v38 = vadd.f32 %v2148_v34, %v2067_v3  ;;  %v751_v34 = vadd.f32 %v2067_v3, %v2084_v20 }
 0x123   : > { %v1676_v51 = vpop.eup %1675  ;;  %v987_v39 = vmul.f32 %v1674_v41, %v2080_v17  ;;  %v2176_v6 = vpop.f32.mrb[25].mxu1  ;;  %1695 = vtanh.f32 %v696_v48 }
 0x124   : > { %v2160_v53 = vpop.f32.mrb[26].mxu0  ;;  %v1678_v60 = vpop.eup %1677  ;;  %v979_v61 = vmul.f32 %v1676_v51, %v2080_v17  ;;  %1697 = vtanh.f32 %v741_v13 }
 0x125   : > { %1066 = vxpose.xlu1.b32.cont [2/16] %v986_v45, 128  ;;  %1042 = vxpose.xlu0.b32.cont [10/16] %v978_v50, 128  ;;  %v710_v56 = vpop.f32.mrb[27].mxu0  ;;  %v1680_v62 = vpop.eup %1679  ;;  %v980_v10 = vmul.f32 %v1678_v60, %v2080_v17  ;;  %1699 = vtanh.f32 %v701_v16  ;;  %v716_v4 = vadd.f32 %v2160_v53, %v2067_v3  ;;  %v766_v53 = vadd.f32 %v2088_v26, %v2067_v3 }
 0x126   : > { %v1682_v7 = vpop.eup %1681  ;;  %v988_v9 = vmul.f32 %v1680_v62, %v2080_v17  ;;  %v2186_v19 = vpop.f32.mrb[26].mxu1  ;;  %v711_v50 = vadd.f32 %v2067_v3, %v710_v56  ;;  %1701 = vtanh.f32 %v746_v31  ;;  %v756_v56 = vadd.f32 %v2082_v18, %v2067_v3 }
 0x127   : > { %v1684_v15 = vpop.eup %1683  ;;  %v989_v23 = vmul.f32 %v1682_v7, %v2080_v17  ;;  %v2189_v25 = vpop.f32.mrb[27].mxu1  ;;  %1703 = vtanh.f32 %v706_v38  ;;  %v771_v26 = vadd.f32 %v2067_v3, %v2096_v35  ;;  %v776_v38 = vadd.f32 %v2094_v33, %v2067_v3 }
 0x128   : > { %v2170_v0 = vpop.f32.mrb[28].mxu0  ;;  %v1686_v27 = vpop.eup %1685  ;;  %v981_v14 = vmul.f32 %v1684_v15, %v2080_v17  ;;  %1705 = vtanh.f32 %v711_v50  ;;  %v821_v50 = vadd.f32 %v2067_v3, %v2136_v11 }
 0x129   : > { %1067 = vxpose.xlu1.b32.cont [3/16] %v987_v39, 128  ;;  %1043 = vxpose.xlu0.b32.cont [11/16] %v979_v61, 128  ;;  %v720_v5 = vpop.f32.mrb[29].mxu0  ;;  %v1688_v29 = vpop.eup %1687  ;;  %v982_v44 = vmul.f32 %v1686_v27, %v2080_v17  ;;  %1707 = vtanh.f32 %v751_v34  ;;  %v726_v16 = vadd.f32 %v2170_v0, %v2067_v3 }
 0x12a   : > { %v2192_v30 = vpop.f32.mrb[28].mxu1  ;;  %v1690_v37 = vpop.eup %1689  ;;  %v990_v41 = vmul.f32 %v1688_v29, %v2080_v17  ;;  %v721_v48 = vadd.f32 %v2067_v3, %v720_v5  ;;  %1709 = vtanh.f32 %v756_v56 }
 0x12b   : > { %v2196_v32 = vpop.f32.mrb[29].mxu1  ;;  %v1692_v45 = vpop.eup %1691  ;;  %v991_v12 = vmul.f32 %v1690_v37, %v2080_v17  ;;  %1711 = vtanh.f32 %v716_v4  ;;  %v791_v4 = vadd.f32 %v2067_v3, %v2114_v49 }
 0x12c   : > { %v2184_v46 = vpop.f32.mrb[30].mxu0  ;;  %v1694_v39 = vpop.eup %1693  ;;  %v983_v59 = vmul.f32 %v1692_v45, %v2080_v17  ;;  %1713 = vtanh.f32 %v721_v48  ;;  %v796_v48 = vadd.f32 %v2110_v47, %v2067_v3 }
 0x12d   : > { %1068 = vxpose.xlu1.b32.cont [4/16] %v988_v9, 128  ;;  %1044 = vxpose.xlu0.b32.cont [12/16] %v980_v10, 128  ;;  %v730_v21 = vpop.f32.mrb[31].mxu0  ;;  %v1696_v60 = vpop.eup %1695  ;;  %v984_v20 = vmul.f32 %v1694_v39, %v2080_v17  ;;  %v761_v10 = vadd.f32 %v2067_v3, %v2090_v28 }
 0x12e   : > { %v2203_v51 = vpop.f32.mrb[30].mxu1  ;;  %v1698_v61 = vpop.eup %1697  ;;  %v992_v7 = vmul.f32 %v1696_v60, %v2080_v17  ;;  %v731_v28 = vadd.f32 %v2067_v3, %v730_v21  ;;  %v826_v60 = vadd.f32 %v2133_v8, %v2067_v3 }
 0x12f   : > { %v2206_v52 = vpop.f32.mrb[31].mxu1  ;;  %v1700_v62 = vpop.eup %1699  ;;  %v1001_v18 = vmul.f32 %v1698_v61, %v2080_v17  ;;  %1715 = vtanh.f32 %v761_v10 }
 0x130   : > { %v993_v9 = vmul.f32 %v1700_v62, %v2080_v17  ;;  %v1702_v13 = vpop.eup %1701  ;;  %1717 = vtanh.f32 %v766_v53  ;;  %v831_v62 = vadd.f32 %v2067_v3, %v2143_v24 }
 0x131   : > { %1069 = vxpose.xlu1.b32.cont [5/16] %v989_v23, 128  ;;  %1045 = vxpose.xlu0.b32.cont [13/16] %v981_v14, 128  ;;  %v1704_v15 = vpop.eup %1703  ;;  %v1002_v27 = vmul.f32 %v1702_v13, %v2080_v17  ;;  %1719 = vtanh.f32 %v726_v16  ;;  %v841_v13 = vadd.f32 %v2067_v3, %v2154_v43  ;;  %v806_v16 = vadd.f32 %v2118_v54, %v2067_v3 }
 0x132   : > { %v1706_v5 = vpop.eup %1705  ;;  %v994_v23 = vmul.f32 %v1704_v15, %v2080_v17  ;;  %1721 = vtanh.f32 %v731_v28  ;;  %v801_v15 = vadd.f32 %v2067_v3, %v2121_v57  ;;  %v851_v28 = vadd.f32 %v2067_v3, %v2165_v58 }
 0x133   : > { %v1708_v14 = vpop.eup %1707  ;;  %v995_v29 = vmul.f32 %v1706_v5, %v2080_v17  ;;  %1723 = vtanh.f32 %v771_v26 }
 0x134   : > { %v1710_v31 = vpop.eup %1709  ;;  %v1003_v37 = vmul.f32 %v1708_v14, %v2080_v17  ;;  %1725 = vtanh.f32 %v776_v38 }
 0x135   : > { %1070 = vxpose.xlu1.b32.cont [6/16] %v990_v41, 128  ;;  %1046 = vxpose.xlu0.b32.cont [14/16] %v982_v44, 128  ;;  %v1712_v0 = vpop.eup %1711  ;;  %v736_v41 = vadd.f32 %v2184_v46, %v2067_v3  ;;  %v1004_v35 = vmul.f32 %v1710_v31, %v2080_v17 }
 0x136   : > { %v1714_v21 = vpop.eup %1713  ;;  %v996_v44 = vmul.f32 %v1712_v0, %v2080_v17  ;;  %v856_v0 = vadd.f32 %v2162_v55, %v2067_v3 }
 0x137   : > { %v997_v33 = vmul.f32 %v1714_v21, %v2080_v17  ;;  %1727 = vtanh.f32 %v736_v41  ;;  %v861_v41 = vadd.f32 %v2067_v3, %v2176_v6 }
 0x138   : > { %1729 = vtanh.f32 %v821_v50  ;;  %v866_v50 = vadd.f32 %v2172_v2, %v2067_v3 }
 0x139   : > { %1071 = vxpose.xlu1.b32.cont [7/16] %v991_v12, 128  ;;  %1047 = vxpose.xlu0.b32.cont [15/16] %v983_v59, 128  ;;  %v1716_v45 = vpop.eup %1715  ;;  %v781_v12 = vadd.f32 %v2067_v3, %v2104_v42  ;;  %v786_v59 = vadd.f32 %v2102_v40, %v2067_v3 }
 0x13a   : > { %v1718_v34 = vpop.eup %1717  ;;  %v1005_v46 = vmul.f32 %v1716_v45, %v2080_v17 }
 0x13b   : > { %v1720_v39 = vpop.eup %1719  ;;  %1731 = vtanh.f32 %v781_v12  ;;  %v1006_v42 = vmul.f32 %v1718_v34, %v2080_v17  ;;  %v871_v34 = vadd.f32 %v2067_v3, %v2189_v25 }
 0x13c   : > { %v1722_v11 = vpop.eup %1721  ;;  %v998_v61 = vmul.f32 %v1720_v39, %v2080_v17  ;;  %1733 = vtanh.f32 %v786_v59 }
 0x13d   : > { %1072 = vxpose.xlu1.b32.cont [8/16] %v992_v7, 128  ;;  %1048 = vxpose.xlu0.b32.end [16/16] %v984_v20, 128  ;;  %v1724_v56 = vpop.eup %1723  ;;  %v999_v40 = vmul.f32 %v1722_v11, %v2080_v17  ;;  %1735 = vtanh.f32 %v826_v60  ;;  %v876_v60 = vadd.f32 %v2186_v19, %v2067_v3  ;;  %v886_v19 = vadd.f32 %v2192_v30, %v2067_v3 }
 0x13e   : > { %v1726_v7 = vpop.eup %1725  ;;  %v1007_v8 = vmul.f32 %v1724_v56, %v2080_v17  ;;  %1737 = vtanh.f32 %v831_v62 }
 0x13f   : > { %1739 = vtanh.f32 %v791_v4  ;;  %v1008_v49 = vmul.f32 %v1726_v7, %v2080_v17 }
 0x140   : > { %1741 = vtanh.f32 %v796_v48 }
 0x141   : > { %1073 = vxpose.xlu1.b32.cont [9/16] %v993_v9, 128  ;;  %1097 = vxpose.xlu0.b32.start [1/16] %v1001_v18, 128  ;;  %v1728_v20 = vpop.eup %1727  ;;  %v836_v9 = vadd.f32 %v2141_v22, %v2067_v3 }
 0x142   : > { %v1730_v24 = vpop.eup %1729  ;;  %v1000_v18 = vmul.f32 %v1728_v20, %v2080_v17 }
 0x143   : > { %v1017_v47 = vmul.f32 %v1730_v24, %v2080_v17  ;;  %1743 = vtanh.f32 %v836_v9 }
 0x144   : > { %1745 = vtanh.f32 %v841_v13 }
 0x145   : > { %1074 = vxpose.xlu1.b32.cont [10/16] %v994_v23, 128  ;;  %1098 = vxpose.xlu0.b32.cont [2/16] %v1002_v27, 128  ;;  %v1732_v10 = vpop.eup %1731  ;;  %1747 = vtanh.f32 %v801_v15  ;;  %v846_v23 = vadd.f32 %v2150_v36, %v2067_v3 }
 0x146   : > { %v1734_v53 = vpop.eup %1733  ;;  %v1009_v22 = vmul.f32 %v1732_v10, %v2080_v17  ;;  %1749 = vtanh.f32 %v806_v16 }
 0x147   : > { %v1736_v5 = vpop.eup %1735  ;;  %v1010_v57 = vmul.f32 %v1734_v53, %v2080_v17  ;;  %1751 = vtanh.f32 %v846_v23 }
 0x148   : > { %v1738_v43 = vpop.eup %1737  ;;  %v1018_v27 = vmul.f32 %v1736_v5, %v2080_v17  ;;  %1753 = vtanh.f32 %v851_v28 }
 0x149   : > { %1075 = vxpose.xlu1.b32.cont [11/16] %v995_v29, 128  ;;  %1099 = vxpose.xlu0.b32.cont [3/16] %v1003_v37, 128  ;;  %v1740_v14 = vpop.eup %1739  ;;  %v1019_v54 = vmul.f32 %v1738_v43, %v2080_v17  ;;  %v811_v29 = vadd.f32 %v2067_v3, %v2128_v1  ;;  %v816_v37 = vadd.f32 %v2126_v63, %v2067_v3 }
 0x14a   : > { %v1742_v26 = vpop.eup %1741  ;;  %v1011_v36 = vmul.f32 %v1740_v14, %v2080_v17 }
 0x14b   : > { %1755 = vtanh.f32 %v811_v29  ;;  %v1012_v1 = vmul.f32 %v1742_v26, %v2080_v17 }
 0x14c   : > { %1757 = vtanh.f32 %v816_v37 }
 0x14d   : > { %1076 = vxpose.xlu1.b32.cont [12/16] %v996_v44, 128  ;;  %1100 = vxpose.xlu0.b32.cont [4/16] %v1004_v35, 128  ;;  %v1744_v31 = vpop.eup %1743  ;;  %1759 = vtanh.f32 %v856_v0 }
 0x14e   : > { %v1746_v58 = vpop.eup %1745  ;;  %v1020_v38 = vmul.f32 %v1744_v31, %v2080_v17  ;;  %1761 = vtanh.f32 %v861_v41 }
 0x14f   : > { %v1748_v21 = vpop.eup %1747  ;;  %v1021_v63 = vmul.f32 %v1746_v58, %v2080_v17  ;;  %1763 = vtanh.f32 %v866_v50 }
 0x150   : > { %v1750_v44 = vpop.eup %1749  ;;  %v1013_v35 = vmul.f32 %v1748_v21, %v2080_v17  ;;  %1765 = vtanh.f32 %v871_v34 }
 0x151   : > { %1077 = vxpose.xlu1.b32.cont [13/16] %v997_v33, 128  ;;  %1101 = vxpose.xlu0.b32.cont [5/16] %v1005_v46, 128  ;;  %v1752_v45 = vpop.eup %1751  ;;  %v1014_v6 = vmul.f32 %v1750_v44, %v2080_v17  ;;  %1767 = vtanh.f32 %v876_v60 }
 0x152   : > { %v1754_v55 = vpop.eup %1753  ;;  %v1022_v33 = vmul.f32 %v1752_v45, %v2080_v17 }
 0x153   : > { %v1023_v46 = vmul.f32 %v1754_v55, %v2080_v17 }
 0x155   : > { %1078 = vxpose.xlu1.b32.cont [14/16] %v998_v61, 128  ;;  %1102 = vxpose.xlu0.b32.cont [6/16] %v1006_v42, 128  ;;  %v1756_v12 = vpop.eup %1755  ;;  %v881_v42 = vadd.f32 %v2067_v3, %v2196_v32 }
 0x156   : > { %v1758_v39 = vpop.eup %1757  ;;  %v1015_v59 = vmul.f32 %v1756_v12, %v2080_v17 }
 0x157   : > { %v1760_v11 = vpop.eup %1759  ;;  %v1016_v25 = vmul.f32 %v1758_v39, %v2080_v17  ;;  %1769 = vtanh.f32 %v881_v42 }
 0x158   : > { %v1762_v2 = vpop.eup %1761  ;;  %v1024_v61 = vmul.f32 %v1760_v11, %v2080_v17  ;;  %1771 = vtanh.f32 %v886_v19 }
 0x159   : > { %1079 = vxpose.xlu1.b32.cont [15/16] %v999_v40, 128  ;;  %1103 = vxpose.xlu0.b32.cont [7/16] %v1007_v8, 128  ;;  %v1025_v56 = vmul.f32 %v1762_v2, %v2080_v17  ;;  %v1764_v62 = vpop.eup %1763  ;;  %v891_v8 = vadd.f32 %v2067_v3, %v2206_v52 }
 0x15a   : > { %v1766_v4 = vpop.eup %1765  ;;  %v1026_v7 = vmul.f32 %v1764_v62, %v2080_v17 }
 0x15b   : > { %v1027_v20 = vmul.f32 %v1766_v4, %v2080_v17  ;;  %v1768_v24 = vpop.eup %1767  ;;  %1773 = vtanh.f32 %v891_v8 }
 0x15c   : > { %v1028_v10 = vmul.f32 %v1768_v24, %v2080_v17 }
 0x15d   : > { %1080 = vxpose.xlu1.b32.end [16/16] %v1000_v18, 128  ;;  %1104 = vxpose.xlu0.b32.cont [8/16] %v1008_v49, 128  ;;  %v896_v49 = vadd.f32 %v2203_v51, %v2067_v3 }
 0x15f   : > { %1775 = vtanh.f32 %v896_v49 }
 0x161   : > { %1129 = vxpose.xlu1.b32.start [1/16] %v1017_v47, 128  ;;  %1105 = vxpose.xlu0.b32.cont [9/16] %v1009_v22, 128  ;;  %v1770_v18 = vpop.eup %1769 }
 0x162   : > { %v1029_v52 = vmul.f32 %v1770_v18, %v2080_v17  ;;  %v1772_v15 = vpop.eup %1771 }
 0x163   : > { %v1030_v16 = vmul.f32 %v1772_v15, %v2080_v17 }
 0x165   : > { %1130 = vxpose.xlu1.b32.cont [2/16] %v1018_v27, 128  ;;  %1106 = vxpose.xlu0.b32.cont [10/16] %v1010_v57, 128  ;;  %v1774_v22 = vpop.eup %1773 }
 0x166   : > { %v1031_v3 = vmul.f32 %v1774_v22, %v2080_v17 }
 0x169   : > { %1131 = vxpose.xlu1.b32.cont [3/16] %v1019_v54, 128  ;;  %1107 = vxpose.xlu0.b32.cont [11/16] %v1011_v36, 128  ;;  %v1776_v23 = vpop.eup %1775 }
 0x16a   : > { %v1032_v14 = vmul.f32 %v1776_v23, %v2080_v17 }
 0x16d   : > { %1132 = vxpose.xlu1.b32.cont [4/16] %v1020_v38, 128  ;;  %1108 = vxpose.xlu0.b32.cont [12/16] %v1012_v1, 128 }
 0x171   : > { %1133 = vxpose.xlu1.b32.cont [5/16] %v1021_v63, 128  ;;  %1109 = vxpose.xlu0.b32.cont [13/16] %v1013_v35, 128 }
 0x175   : > { %1134 = vxpose.xlu1.b32.cont [6/16] %v1022_v33, 128  ;;  %1110 = vxpose.xlu0.b32.cont [14/16] %v1014_v6, 128 }
 0x179   : > { %1135 = vxpose.xlu1.b32.cont [7/16] %v1023_v46, 128  ;;  %1111 = vxpose.xlu0.b32.cont [15/16] %v1015_v59, 128 }
 0x17d   : > { %1136 = vxpose.xlu1.b32.cont [8/16] %v1024_v61, 128  ;;  %1112 = vxpose.xlu0.b32.end [16/16] %v1016_v25, 128 }
 0x181   : > { %1137 = vxpose.xlu1.b32.cont [9/16] %v1025_v56, 128  ;;  %v1049_v40 = vpop.trf.xlu0 }
 0x185   : > { %1138 = vxpose.xlu1.b32.cont [10/16] %v1026_v7, 128  ;;  %v1050_v32 = vpop.trf.xlu0 }
 0x186   : > { %v1161_v48 = vadd.f32 %v1050_v32, %v1049_v40 }
 0x189   : > { %1139 = vxpose.xlu1.b32.cont [11/16] %v1027_v20, 128  ;;  %v1051_v9 = vpop.trf.xlu0 }
 0x18a   : > { %v1162_v30 = vadd.f32 %v1161_v48, %v1051_v9 }
 0x18d   : > { %1140 = vxpose.xlu1.b32.cont [12/16] %v1028_v10, 128  ;;  %v1052_v13 = vpop.trf.xlu0 }
 0x18e   : > { %v1163_v47 = vadd.f32 %v1162_v30, %v1052_v13 }
 0x191   : > { %1141 = vxpose.xlu1.b32.cont [13/16] %v1029_v52, 128  ;;  %v1053_v53 = vpop.trf.xlu0 }
 0x192   : > { %v1164_v5 = vadd.f32 %v1163_v47, %v1053_v53 }
 0x195   : > { %1142 = vxpose.xlu1.b32.cont [14/16] %v1030_v16, 128  ;;  %v1054_v43 = vpop.trf.xlu0 }
 0x196   : > { %v1165_v51 = vadd.f32 %v1164_v5, %v1054_v43 }
 0x199   : > { %1143 = vxpose.xlu1.b32.cont [15/16] %v1031_v3, 128  ;;  %v1055_v27 = vpop.trf.xlu0 }
 0x19a   : > { %v1166_v57 = vadd.f32 %v1165_v51, %v1055_v27 }
 0x19d   : > { %1144 = vxpose.xlu1.b32.end [16/16] %v1032_v14, 128  ;;  %v1056_v28 = vpop.trf.xlu0 }
 0x19e   : > { %v1167_v54 = vadd.f32 %v1166_v57, %v1056_v28 }
 0x1a1   : > { %v1081_v29 = vpop.trf.xlu1  ;;  %v1057_v26 = vpop.trf.xlu0 }
 0x1a2   : > { %v1168_v36 = vadd.f32 %v1167_v54, %v1057_v26 }
 0x1a5   : > { %v1082_v31 = vpop.trf.xlu1  ;;  %v1058_v37 = vpop.trf.xlu0 }
 0x1a6   : > { %v1182_v58 = vadd.f32 %v1082_v31, %v1081_v29  ;;  %v1169_v0 = vadd.f32 %v1168_v36, %v1058_v37 }
 0x1a9   : > { %v1083_v38 = vpop.trf.xlu1  ;;  %v1059_v1 = vpop.trf.xlu0 }
 0x1aa   : > { %v1183_v21 = vadd.f32 %v1182_v58, %v1083_v38  ;;  %v1170_v41 = vadd.f32 %v1169_v0, %v1059_v1 }
 0x1ad   : > { %v1084_v63 = vpop.trf.xlu1  ;;  %v1060_v44 = vpop.trf.xlu0 }
 0x1ae   : > { %v1184_v35 = vadd.f32 %v1183_v21, %v1084_v63  ;;  %v1171_v45 = vadd.f32 %v1170_v41, %v1060_v44  ;;  %v2319_v41 = vstv %s250_s4 }
 0x1b1   : > { %v1085_v55 = vpop.trf.xlu1  ;;  %v1061_v17 = vpop.trf.xlu0 }
 0x1b2   : > { %v1185_v50 = vadd.f32 %v1184_v35, %v1085_v55  ;;  %v1172_v33 = vadd.f32 %v1171_v45, %v1061_v17 }
 0x1b5   : > { %v1086_v6 = vpop.trf.xlu1  ;;  %v1062_v12 = vpop.trf.xlu0 }
 0x1b6   : > { %v1186_v34 = vadd.f32 %v1185_v50, %v1086_v6  ;;  %v1173_v46 = vadd.f32 %v1172_v33, %v1062_v12 }
 0x1b9   : > { %v1087_v39 = vpop.trf.xlu1  ;;  %v1063_v59 = vpop.trf.xlu0 }
 0x1ba   : > { %v1187_v11 = vadd.f32 %v1186_v34, %v1087_v39  ;;  %v1174_v2 = vadd.f32 %v1173_v46, %v1063_v59 }
 0x1bd   : > { %v1088_v60 = vpop.trf.xlu1  ;;  %v1064_v61 = vpop.trf.xlu0 }
 0x1be   : > { %v1188_v25 = vadd.f32 %v1187_v11, %v1088_v60  ;;  %v1175_v42 = vadd.f32 %v1174_v2, %v1064_v61 }
 0x1c0   : > { %v1176_v10 = vrot.slane %v1175_v42, 4 }
 0x1c1   : > { %v1089_v56 = vpop.trf.xlu1  ;;  %v1113_v62 = vpop.trf.xlu0 }
 0x1c2   : > { %v1189_v40 = vadd.f32 %v1188_v25, %v1089_v56  ;;  %v1177_v15 = vadd.f32 %v1176_v10, %v1175_v42 }
 0x1c4   : > { %v1178_v43 = vrot.slane %v1177_v15, 2 }
 0x1c5   : > { %v1090_v4 = vpop.trf.xlu1  ;;  %v1114_v19 = vpop.trf.xlu0 }
 0x1c6   : > { %v1190_v7 = vadd.f32 %v1189_v40, %v1090_v4  ;;  %v1203_v53 = vadd.f32 %v1114_v19, %v1113_v62  ;;  %v1179_v57 = vadd.f32 %v1178_v43, %v1177_v15 }
 0x1c8   : > { %v1180_v36 = vrot.slane %v1179_v57, 1 }
 0x1c9   : > { %v1091_v8 = vpop.trf.xlu1  ;;  %v1115_v32 = vpop.trf.xlu0 }
 0x1ca   : > { %v1191_v20 = vadd.f32 %v1190_v7, %v1091_v8  ;;  %v1204_v3 = vadd.f32 %v1203_v53, %v1115_v32  ;;  %v1181_v38 = vadd.f32 %v1180_v36, %v1179_v57 }
 0x1cc   : > { %v2322_v45 = vadd.f32 %v2319_v41, %v1181_v38  ;;  %v1259_v38 = vlaneseq }
 0x1cd   : > { %v1092_v48 = vpop.trf.xlu1  ;;  %v1116_v24 = vpop.trf.xlu0 }
 0x1ce   : > { %v1192_v9 = vadd.f32 %v1191_v20, %v1092_v48  ;;  %v1205_v14 = vadd.f32 %v1204_v3, %v1116_v24  ;;  %vm1281_vm1 = vcmp.lt.s32.totalorder %v1259_v38, 512 }
 0x1d1   : > { %v1093_v18 = vpop.trf.xlu1  ;;  %v1117_v49 = vpop.trf.xlu0 }
 0x1d2   : > { %v1193_v30 = vadd.f32 %v1192_v9, %v1093_v18  ;;  %v1206_v31 = vadd.f32 %v1205_v14, %v1117_v49 }
 0x1d5   : > { %v1094_v13 = vpop.trf.xlu1  ;;  %v1118_v52 = vpop.trf.xlu0 }
 0x1d6   : > { %v1194_v47 = vadd.f32 %v1193_v30, %v1094_v13  ;;  %v1207_v1 = vadd.f32 %v1206_v31, %v1118_v52 }
 0x1d9   : > { %v1095_v22 = vpop.trf.xlu1  ;;  %v1119_v5 = vpop.trf.xlu0 }
 0x1da   : > { %v1195_v16 = vadd.f32 %v1194_v47, %v1095_v22  ;;  %v1208_v55 = vadd.f32 %v1207_v1, %v1119_v5 }
 0x1dd   : > { %v1096_v51 = vpop.trf.xlu1  ;;  %v1120_v23 = vpop.trf.xlu0 }
 0x1de   : > { %v1196_v27 = vadd.f32 %v1195_v16, %v1096_v51  ;;  %v1209_v12 = vadd.f32 %v1208_v55, %v1120_v23 }
 0x1e0   : > { %v1197_v28 = vrot.slane %v1196_v27, 4 }
 0x1e1   : > { %v1145_v54 = vpop.trf.xlu1  ;;  %v1121_v26 = vpop.trf.xlu0 }
 0x1e2   : > { %v1198_v29 = vadd.f32 %v1197_v28, %v1196_v27  ;;  %v1210_v46 = vadd.f32 %v1209_v12, %v1121_v26 }
 0x1e4   : > { %v1199_v37 = vrot.slane %v1198_v29, 2 }
 0x1e5   : > { %v1146_v58 = vpop.trf.xlu1  ;;  %v1122_v63 = vpop.trf.xlu0 }
 0x1e6   : > { %v1200_v0 = vadd.f32 %v1199_v37, %v1198_v29  ;;  %v1211_v11 = vadd.f32 %v1210_v46, %v1122_v63  ;;  %v1224_v40 = vadd.f32 %v1146_v58, %v1145_v54  ;;  %v1841_v58 = vmov 1966171168  }
 0x1e8   : > { %v1201_v21 = vrot.slane %v1200_v0, 1 }
 0x1e9   : > { %v1147_v44 = vpop.trf.xlu1  ;;  %v1123_v6 = vpop.trf.xlu0 }
 0x1ea   : > { %v1202_v35 = vadd.f32 %v1201_v21, %v1200_v0  ;;  %v1212_v61 = vadd.f32 %v1211_v11, %v1123_v6  ;;  %v1225_v4 = vadd.f32 %v1224_v40, %v1147_v44  ;;  %v1257_v0 = vunpack.c.l.s4 %v1841_v58 }
 0x1ec   : > { %v2325_v17 = vadd.f32 %v2319_v41, %v1202_v35  ;;  %v1258_v44 = vunpack.c.0.s8 %v1257_v0  ;;  %v1260_v35 = vshrl.u32 %v1259_v38, 7 }
 0x1ed   : > { %v1148_v50 = vpop.trf.xlu1  ;;  %v1124_v39 = vpop.trf.xlu0 }
 0x1ee   : > { %v1254_v33 = vcombine.low %v2322_v45, %v2325_v17  ;;  %v1213_v42 = vadd.f32 %v1212_v61, %v1124_v39  ;;  %v1226_v8 = vadd.f32 %v1225_v4, %v1148_v50  ;;  %v1261_v12 = vsub.s32 %v1258_v44, %v1260_v35 }
 0x1f0   : > { %v1262_v46 = vrot.slane %v1254_v33, %v1261_v12 }
 0x1f1   : > { %v1149_v34 = vpop.trf.xlu1  ;;  %v1125_v60 = vpop.trf.xlu0 }
 0x1f2   : > { %v1214_v19 = vadd.f32 %v1213_v42, %v1125_v60  ;;  %v1227_v20 = vadd.f32 %v1226_v8, %v1149_v34 }
 0x1f5   : > { %v1150_v59 = vpop.trf.xlu1  ;;  %v1126_v56 = vpop.trf.xlu0 }
 0x1f6   : > { %v1215_v48 = vadd.f32 %v1214_v19, %v1126_v56  ;;  %v1228_v9 = vadd.f32 %v1227_v20, %v1150_v59 }
 0x1f9   : > { %v1151_v2 = vpop.trf.xlu1  ;;  %v1127_v32 = vpop.trf.xlu0 }
 0x1fa   : > { %v1229_v18 = vadd.f32 %v1228_v9, %v1151_v2  ;;  %v1216_v49 = vadd.f32 %v1215_v48, %v1127_v32 }
 0x1fd   : > { %v1152_v25 = vpop.trf.xlu1  ;;  %v1128_v30 = vpop.trf.xlu0 }
 0x1fe   : > { %v1230_v13 = vadd.f32 %v1229_v18, %v1152_v25  ;;  %v1217_v52 = vadd.f32 %v1216_v49, %v1128_v30 }
 0x200   : > { %v1218_v22 = vrot.slane %v1217_v52, 4 }
 0x201   : > { %v1153_v62 = vpop.trf.xlu1 }
 0x202   : > { %v1231_v47 = vadd.f32 %v1230_v13, %v1153_v62  ;;  %v1219_v3 = vadd.f32 %v1218_v22, %v1217_v52 }
 0x204   : > { %v1220_v57 = vrot.slane %v1219_v3, 2 }
 0x205   : > { %v1154_v7 = vpop.trf.xlu1 }
 0x206   : > { %v1232_v53 = vadd.f32 %v1231_v47, %v1154_v7  ;;  %v1221_v29 = vadd.f32 %v1220_v57, %v1219_v3 }
 0x208   : > { %v1222_v31 = vrot.slane %v1221_v29, 1 }
 0x209   : > { %v1155_v24 = vpop.trf.xlu1 }
 0x20a   : > { %v1233_v5 = vadd.f32 %v1232_v53, %v1155_v24  ;;  %v1223_v21 = vadd.f32 %v1222_v31, %v1221_v29 }
 0x20c   : > { %v1248_v50 = vadd.f32 %v2319_v41, %v1223_v21 }
 0x20d   : > { %v1156_v10 = vpop.trf.xlu1 }
 0x20e   : > { %v1234_v43 = vadd.f32 %v1233_v5, %v1156_v10 }
 0x211   : > { %v1157_v15 = vpop.trf.xlu1 }
 0x212   : > { %v1235_v51 = vadd.f32 %v1234_v43, %v1157_v15 }
 0x215   : > { %v1158_v16 = vpop.trf.xlu1 }
 0x216   : > { %v1236_v27 = vadd.f32 %v1235_v51, %v1158_v16 }
 0x219   : > { %v1159_v23 = vpop.trf.xlu1 }
 0x21a   : > { %v1237_v14 = vadd.f32 %v1236_v27, %v1159_v23 }
 0x21d   : > { %v1160_v28 = vpop.trf.xlu1 }
 0x21e   : > { %v1238_v54 = vadd.f32 %v1237_v14, %v1160_v28 }
 0x220   : > { %v1239_v26 = vrot.slane %v1238_v54, 4 }
 0x222   : > { %v1240_v36 = vadd.f32 %v1239_v26, %v1238_v54 }
 0x224   : > { %v1241_v37 = vrot.slane %v1240_v36, 2 }
 0x226   : > { %v1242_v1 = vadd.f32 %v1241_v37, %v1240_v36 }
 0x228   : > { %v1243_v63 = vrot.slane %v1242_v1, 1 }
 0x22a   : > { %v1244_v55 = vadd.f32 %v1243_v63, %v1242_v1 }
 0x22c   : > { %v1249_v6 = vadd.f32 %v2319_v41, %v1244_v55 }
 0x22e   : > { %v1255_v34 = vcombine.low %v1248_v50, %v1249_v6 }
 0x230   : > { %v1269_v39 = vrot.slane %v1255_v34, %v1261_v12 }
 0x232   : > { %v1270_v59 = vcombine.low %v1262_v46, %v1269_v39 }
 0x234   : > { %v1277_v11 = vrot.slane %v1270_v59, %v1261_v12 }
 0x236   : > { %1283 = vst.msk [vmem:[%s231_s27] sm:$0xf] %vm1281_vm1, %v1277_v11 }
 0x237   : > { %1790 = shalt.err (!%p1787_p3)
}
 0x238   : > { %s1791_s10 = scalar_lea.hbm %s2339_s9, 64  ;;  %s1795_s18 = scalar_lea.hbm %s2386_s5, 128 }
 0x239   : > { %p1792_p4 = scmp.ne.s32.totalorder %s2339_s9, %s1791_s10  ;;  %p1796_p9 = scmp.lt.u32.totalorder %s2339_s9, %s2386_s5 }
 0x23a   : > { %p1797_p10 = scmp.lt.u32.totalorder %s1795_s18, %s1791_s10  ;;  %p1799_p12 = scmp.lt.u32.totalorder %s1791_s10, %s2339_s9 }
 0x23b   : > { %p1793_p7 = pnand %p1792_p4, %p1911_p5 }
 0x23c   : > { %p1798_p11 = por %p1797_p10, %p1796_p9 }
 0x23d   : > { %p1794_p8 = pneg %p1793_p7 }
 0x23e   : > { %p1800_p13 = por %p1799_p12, %p1798_p11 }
 0x240   : > { %p1801_p0 = pnand %p1800_p13, %p1794_p8 }
 0x242   : > { %1804 = shalt.err (!%p1801_p0)
}
 0x243   : > { %1609 = dma.vmem_to_hbm [thread:$0]  (%p1911_p5), %s2341_s6, 64, %s2339_s9, %s1285_s11  }
 0x244 PF: > { %p1615_p1 = scmp.ge.s32.totalorder %s1839_s23, 2  ;;  %s1311_s24 = sand.u32 1, %s1827_s20  }
 0x245   : > { %s1312_s26 = scalar_lea.sflag [#allocation4], %s1311_s24 }
 0x246   : > { %p1612_p2 = pnand %p1615_p1, %p1915_p6 }
 0x248   : > { %1822 = dma.done.wait (!%p1612_p2), %s1312_s26, 64  }
 0x249   : > { %1824 = vsyncadd (!%p1612_p2), %s1312_s26, 4294967232  ;;  %p16_p3 = scmp.ge.s32.totalorder %s1899_s25, 4   ;;  %s2389_s20 = smov %s1831_s21 }
 0x24a   : > { %s2390_s21 = smov %s1835_s22  ;;  %s2391_s22 = smov %s1909_s28 }
 0x24b   : > { %s2392_s23 = smov %s1899_s25  ;;  %18 = sbr.rel (!%p16_p3) target bundleno = 5 (0x5), region = 75 }
 0x252   :  { %1317 = vsyncpa [#allocation4], 1 }
 0x253   :  { %1319 = vsyncpa [#allocation4 + $0x1], 1 }

</bundles_post_ra>
